<compile_context>
chip_gen: v7x
topology: tpu7x:2x2x1
jax: 0.10.0
libtpu: 0.0.40
codegen_flags: <defaults>
</compile_context>

<pallas_src>
import functools

import numpy as np
import jax
import jax.numpy as jnp
from jax.experimental import pallas as pl
from jax.experimental.pallas import tpu as pltpu


def get_padding_for_same(kernel_size):
    pad1 = kernel_size // 2
    pad0 = pad1 - 1 if kernel_size % 2 == 0 else pad1
    return pad0, pad1


def gaussian_1d(kernel_size, sigma):
    ax = np.arange(kernel_size, dtype=np.float32)
    mean = (kernel_size - 1) / 2.0
    g = np.exp(-((ax - mean) ** 2) / (2.0 * float(sigma) ** 2))
    return (g / g.sum()).astype(np.float32)


@functools.lru_cache(maxsize=None)
def _blur_decimate_matrix(n_in, n_out, g1_tuple, pad, stride):
    """M[o, i] = g1[i + pad - o*stride] for taps landing inside [0, n_in).

    Encodes 1-D 'same' zero-padded blur + stride-`stride` decimation.
    Cached per (n_in, n_out, taps, pad, stride) so repeated forward() calls
    don't rebuild / re-upload it.
    """
    g1 = np.asarray(g1_tuple, dtype=np.float32)
    K = g1.shape[0]
    m = np.zeros((n_out, n_in), dtype=np.float32)
    for o in range(n_out):
        base = o * stride - pad
        for k in range(K):
            i = base + k
            if 0 <= i < n_in:
                m[o, i] = g1[k]
    return m


def blur_downsample_kernel(x_ref, bw_ref, bh_ref, o_ref):
    # x_ref: (B, H, W) planes; bw_ref: (W, Wout); bh_ref: (Hout, H);
    # o_ref: (B, Hout, Wout).  Operands stay in their native dtype (bf16 stays
    # bf16); accumulation happens in f32 on the MXU.
    B, H, W = x_ref.shape
    Wout = bw_ref.shape[1]
    bw = bw_ref[...]
    bh = bh_ref[...]
    x = x_ref[...]

    # Row pass (blur + decimate along W): one lane-dense (B*H, W)@(W, Wout)
    # MXU matmul for the whole block of planes.
    tmp = jnp.dot(x.reshape(B * H, W), bw, preferred_element_type=jnp.float32)
    tmp = tmp.reshape(B, H, Wout).astype(x.dtype)

    # Column pass (blur + decimate along H): per-plane matmuls, statically
    # unrolled over the (small) B block.
    for b in range(B):
        o_ref[b] = jnp.dot(bh, tmp[b],
                           preferred_element_type=jnp.float32).astype(o_ref.dtype)


def make_antialias_downsample2d(scale):
    """Builds a callable equivalent to AntiAliasDownsample2d(scale).forward (NCHW)."""
    assert scale <= 1
    if scale == 1.0:
        return lambda x: x

    sigma = (1.0 / scale - 1.0) / 2.0
    kernel_size = 2 * round(sigma * 4) + 1
    pad0, pad1 = get_padding_for_same(kernel_size)
    pad = max(pad0, pad1)
    s = int(1.0 / scale)
    g1 = tuple(float(v) for v in gaussian_1d(kernel_size, sigma))  # hashable

    def _forward(x_nchw):
        N, C, H, W = x_nchw.shape
        Hout = (H - 1) // s + 1
        Wout = (W - 1) // s + 1
        NC = N * C
        itemsize = jnp.dtype(x_nchw.dtype).itemsize

        bh_np = _blur_decimate_matrix(H, Hout, g1, pad, s)       # (Hout, H)
        bw_np = _blur_decimate_matrix(W, Wout, g1, pad, s).T     # (W, Wout)
        # Keep the small resident blur matrices in the input dtype.
        bh = jnp.asarray(bh_np, dtype=x_nchw.dtype)
        bw = jnp.asarray(bw_np, dtype=x_nchw.dtype)

        # ---- choose how many planes per grid step ----------------------
        plane_bytes = max(H * W * itemsize, 1)
        target_bytes = 2 << 20                  # ~2 MiB input block per step
        B = max(1, min(NC, target_bytes // plane_bytes))
        B = min(B, 16)                          # bound column-pass unroll
        while NC % B:                           # B must divide NC
            B -= 1
        if NC // B < 2 and NC >= 2:             # >=2 steps so both v7x TCs work
            B = max(1, NC // 2)
            while NC % B:
                B -= 1
        num_steps = NC // B

        # Free reshape: fold batch and channel into one "parallel" grid axis.
        x_planes = x_nchw.reshape(NC, H, W)

        # Explicit VMEM budget: double-buffered in/out blocks + Bh/Bw buffers
        # + headroom, clamped to v7x's 64 MiB physical VMEM.
        vmem_needed = (2 * B * (H * W + Hout * Wout)
                       + 2 * (Hout * H + W * Wout)) * itemsize
        vmem_limit = int(min(max(vmem_needed + (4 << 20), 16 << 20), 64 << 20))

        cost = pl.CostEstimate(
            flops=2 * NC * H * Wout * (W + Hout),
            transcendentals=0,
            bytes_accessed=(NC * (H * W + Hout * Wout)
                            + Hout * H + W * Wout) * itemsize,
        )

        out_planes = pl.pallas_call(
            blur_downsample_kernel,
            out_shape=jax.ShapeDtypeStruct((NC, Hout, Wout), x_nchw.dtype),
            grid=(num_steps,),
            in_specs=[
                pl.BlockSpec((B, H, W), lambda p: (p, 0, 0)),
                pl.BlockSpec((W, Wout), lambda p: (0, 0)),   # resident, never re-fetched
                pl.BlockSpec((Hout, H), lambda p: (0, 0)),   # resident, never re-fetched
            ],
            out_specs=pl.BlockSpec((B, Hout, Wout), lambda p: (p, 0, 0)),
            compiler_params=pltpu.CompilerParams(
                dimension_semantics=("parallel",),
                vmem_limit_bytes=vmem_limit),
            cost_estimate=cost,
        )(x_planes, bw, bh)

        return out_planes.reshape(N, C, Hout, Wout)

    return jax.jit(_forward)


def _reference(x_nchw, scale):
    """Pure-JAX f32 reference matching the PyTorch forward (cross-correlation)."""
    sigma = (1.0 / scale - 1.0) / 2.0
    kernel_size = 2 * round(sigma * 4) + 1
    pad0, pad1 = get_padding_for_same(kernel_size)
    pad = max(pad0, pad1)
    ax = np.arange(kernel_size, dtype=np.float32)
    mean = (kernel_size - 1) / 2.0
    g = np.exp(-((ax - mean) ** 2) / (2.0 * float(sigma) ** 2))
    k2d = np.outer(g, g)
    k2d = (k2d / k2d.sum()).astype(np.float32)
    w = jnp.asarray(k2d)
    s = int(1.0 / scale)
    N, C, H, W = x_nchw.shape
    xp = jnp.pad(x_nchw.astype(jnp.float32),
                 ((0, 0), (0, 0), (pad, pad), (pad, pad)))
    out = jnp.zeros((N, C, H, W), jnp.float32)
    for kh in range(kernel_size):
        for kw in range(kernel_size):
            out = out + w[kh, kw] * xp[:, :, kh:kh + H, kw:kw + W]
    return out[:, :, ::s, ::s].astype(x_nchw.dtype)


if __name__ == "__main__":
    scale = 0.5  # -> sigma=0.5, kernel_size=5, pad=2, int_inv_scale=2
    key = jax.random.PRNGKey(0)
    x = jax.random.normal(key, (2, 4, 16, 16), dtype=jnp.float32)  # NCHW

    aa_down = make_antialias_downsample2d(scale)
    out = jax.block_until_ready(aa_down(x))

    ref = jax.block_until_ready(_reference(x, scale))
    assert out.shape == (2, 4, 8, 8), out.shape
    # Tolerance accounts for the default-precision MXU path (operands rounded
    # to bf16 internally); a structural bug (wrong pad/stride) gives O(1) error.
    max_err = float(jnp.max(jnp.abs(out.astype(jnp.float32) - ref.astype(jnp.float32))))
    assert max_err < 4e-2, f"mismatch vs reference: max abs err {max_err}"
    print("KERNEL_OK")
</pallas_src>

<mosaic_0001>
module attributes {stable_mosaic.version = 11 : i64} {
  func.func @blur_downsample_kernel(%arg0: i32, %arg1: memref<4x16x16xf32, #tpu.memory_space<vmem>>, %arg2: memref<16x8xf32, #tpu.memory_space<vmem>>, %arg3: memref<8x16xf32, #tpu.memory_space<vmem>>, %arg4: memref<4x8x8xf32, #tpu.memory_space<vmem>>) attributes {dimension_semantics = [#tpu.dimension_semantics<parallel>], iteration_bounds = array<i64: 2>, scalar_prefetch = 0 : i64, scratch_operands = 0 : i64, tpu.core_type = #tpu.core_type<tc>, window_params = [{transform_indices = @transform_0, window_bounds = array<i64: 4, 16, 16>}, {pipeline_mode = #tpu.pipeline_mode<synchronous>, transform_indices = @transform_1, window_bounds = array<i64: 16, 8>}, {pipeline_mode = #tpu.pipeline_mode<synchronous>, transform_indices = @transform_2, window_bounds = array<i64: 8, 16>}, {transform_indices = @transform_3, window_bounds = array<i64: 4, 8, 8>}]} {
    %c0 = arith.constant 0 : index
    %c0_0 = arith.constant 0 : index
    %0 = vector.load %arg2[%c0, %c0_0] : memref<16x8xf32, #tpu.memory_space<vmem>>, vector<16x8xf32>
    %c0_1 = arith.constant 0 : index
    %c0_2 = arith.constant 0 : index
    %1 = vector.load %arg3[%c0_1, %c0_2] : memref<8x16xf32, #tpu.memory_space<vmem>>, vector<8x16xf32>
    %c0_3 = arith.constant 0 : index
    %c0_4 = arith.constant 0 : index
    %c0_5 = arith.constant 0 : index
    %2 = vector.load %arg1[%c0_3, %c0_4, %c0_5] : memref<4x16x16xf32, #tpu.memory_space<vmem>>, vector<4x16x16xf32>
    %3 = vector.shape_cast %2 : vector<4x16x16xf32> to vector<64x16xf32>
    %cst = arith.constant dense<0.000000e+00> : vector<64x8xf32>
    %4 = tpu.matmul %3, %0, %cst {dimension_numbers = #tpu.dot_dimension_numbers<[1], [0], [0], [1], [0, 0, 1, 1], [], []>} : vector<64x16xf32>, vector<16x8xf32>, vector<64x8xf32> -> vector<64x8xf32>
    %5 = vector.shape_cast %4 : vector<64x8xf32> to vector<4x16x8xf32>
    %6 = vector.extract_strided_slice %5 {offsets = [0, 0, 0], sizes = [1, 16, 8], strides = [1, 1, 1]} : vector<4x16x8xf32> to vector<1x16x8xf32>
    %7 = vector.shape_cast %6 : vector<1x16x8xf32> to vector<16x8xf32>
    %cst_6 = arith.constant dense<0.000000e+00> : vector<8x8xf32>
    %8 = tpu.matmul %1, %7, %cst_6 {dimension_numbers = #tpu.dot_dimension_numbers<[1], [0], [0], [1], [0, 0, 1, 1], [], []>} : vector<8x16xf32>, vector<16x8xf32>, vector<8x8xf32> -> vector<8x8xf32>
    %c0_7 = arith.constant 0 : index
    %c0_8 = arith.constant 0 : index
    %c0_9 = arith.constant 0 : index
    %9 = vector.load %arg4[%c0_7, %c0_8, %c0_9] : memref<4x8x8xf32, #tpu.memory_space<vmem>>, vector<1x8x8xf32>
    %10 = vector.shape_cast %9 : vector<1x8x8xf32> to vector<8x8xf32>
    %11 = vector.shape_cast %8 : vector<8x8xf32> to vector<1x8x8xf32>
    tpu.vector_store %arg4[%c0_7, %c0_8, %c0_9], %11 {strides = array<i32>} : memref<4x8x8xf32, #tpu.memory_space<vmem>>, vector<1x8x8xf32>,
    %12 = vector.extract_strided_slice %5 {offsets = [1, 0, 0], sizes = [1, 16, 8], strides = [1, 1, 1]} : vector<4x16x8xf32> to vector<1x16x8xf32>
    %13 = vector.shape_cast %12 : vector<1x16x8xf32> to vector<16x8xf32>
    %cst_10 = arith.constant dense<0.000000e+00> : vector<8x8xf32>
    %14 = tpu.matmul %1, %13, %cst_10 {dimension_numbers = #tpu.dot_dimension_numbers<[1], [0], [0], [1], [0, 0, 1, 1], [], []>} : vector<8x16xf32>, vector<16x8xf32>, vector<8x8xf32> -> vector<8x8xf32>
    %c1 = arith.constant 1 : index
    %c0_11 = arith.constant 0 : index
    %c0_12 = arith.constant 0 : index
    %15 = vector.load %arg4[%c1, %c0_11, %c0_12] : memref<4x8x8xf32, #tpu.memory_space<vmem>>, vector<1x8x8xf32>
    %16 = vector.shape_cast %15 : vector<1x8x8xf32> to vector<8x8xf32>
    %17 = vector.shape_cast %14 : vector<8x8xf32> to vector<1x8x8xf32>
    tpu.vector_store %arg4[%c1, %c0_11, %c0_12], %17 {strides = array<i32>} : memref<4x8x8xf32, #tpu.memory_space<vmem>>, vector<1x8x8xf32>,
    %18 = vector.extract_strided_slice %5 {offsets = [2, 0, 0], sizes = [1, 16, 8], strides = [1, 1, 1]} : vector<4x16x8xf32> to vector<1x16x8xf32>
    %19 = vector.shape_cast %18 : vector<1x16x8xf32> to vector<16x8xf32>
    %cst_13 = arith.constant dense<0.000000e+00> : vector<8x8xf32>
    %20 = tpu.matmul %1, %19, %cst_13 {dimension_numbers = #tpu.dot_dimension_numbers<[1], [0], [0], [1], [0, 0, 1, 1], [], []>} : vector<8x16xf32>, vector<16x8xf32>, vector<8x8xf32> -> vector<8x8xf32>
    %c2 = arith.constant 2 : index
    %c0_14 = arith.constant 0 : index
    %c0_15 = arith.constant 0 : index
    %21 = vector.load %arg4[%c2, %c0_14, %c0_15] : memref<4x8x8xf32, #tpu.memory_space<vmem>>, vector<1x8x8xf32>
    %22 = vector.shape_cast %21 : vector<1x8x8xf32> to vector<8x8xf32>
    %23 = vector.shape_cast %20 : vector<8x8xf32> to vector<1x8x8xf32>
    tpu.vector_store %arg4[%c2, %c0_14, %c0_15], %23 {strides = array<i32>} : memref<4x8x8xf32, #tpu.memory_space<vmem>>, vector<1x8x8xf32>,
    %24 = vector.extract_strided_slice %5 {offsets = [3, 0, 0], sizes = [1, 16, 8], strides = [1, 1, 1]} : vector<4x16x8xf32> to vector<1x16x8xf32>
    %25 = vector.shape_cast %24 : vector<1x16x8xf32> to vector<16x8xf32>
    %cst_16 = arith.constant dense<0.000000e+00> : vector<8x8xf32>
    %26 = tpu.matmul %1, %25, %cst_16 {dimension_numbers = #tpu.dot_dimension_numbers<[1], [0], [0], [1], [0, 0, 1, 1], [], []>} : vector<8x16xf32>, vector<16x8xf32>, vector<8x8xf32> -> vector<8x8xf32>
    %c3 = arith.constant 3 : index
    %c0_17 = arith.constant 0 : index
    %c0_18 = arith.constant 0 : index
    %27 = vector.load %arg4[%c3, %c0_17, %c0_18] : memref<4x8x8xf32, #tpu.memory_space<vmem>>, vector<1x8x8xf32>
    %28 = vector.shape_cast %27 : vector<1x8x8xf32> to vector<8x8xf32>
    %29 = vector.shape_cast %26 : vector<8x8xf32> to vector<1x8x8xf32>
    tpu.vector_store %arg4[%c3, %c0_17, %c0_18], %29 {strides = array<i32>} : memref<4x8x8xf32, #tpu.memory_space<vmem>>, vector<1x8x8xf32>,
    return
  }
  func.func @transform_0(%arg0: i32) -> (i32, i32, i32) {
    %c0_i32 = arith.constant 0 : i32
    %c0_i32_0 = arith.constant 0 : i32
    %c0_i32_1 = arith.constant 0 : i32
    return %arg0, %c0_i32, %c0_i32_0 : i32, i32, i32
  }
  func.func @transform_1(%arg0: i32) -> (i32, i32) {
    %c0_i32 = arith.constant 0 : i32
    %c0_i32_0 = arith.constant 0 : i32
    %c0_i32_1 = arith.constant 0 : i32
    return %c0_i32, %c0_i32_0 : i32, i32
  }
  func.func @transform_2(%arg0: i32) -> (i32, i32) {
    %c0_i32 = arith.constant 0 : i32
    %c0_i32_0 = arith.constant 0 : i32
    %c0_i32_1 = arith.constant 0 : i32
    return %c0_i32, %c0_i32_0 : i32, i32
  }
  func.func @transform_3(%arg0: i32) -> (i32, i32, i32) {
    %c0_i32 = arith.constant 0 : i32
    %c0_i32_0 = arith.constant 0 : i32
    %c0_i32_1 = arith.constant 0 : i32
    return %arg0, %c0_i32, %c0_i32_0 : i32, i32, i32
  }
}

</mosaic_0001>

<bundles_post_ra>
// kernel: _forward.1
= control target key start
LH: loop header
LB: loop body
LE: loop exit
PB: predicated region body
PF: predicated region fallthrough
CT: control target
= control target key end

     0   :  { %8 = vsyncpa [#allocation3], 0  ;;  %s1400_s0 = inlined_call_operand.hbm [shape: f32[8,16,16], index: 0, kind: input, shape index: {}]   ;;  %s1401_s1 = inlined_call_operand.hbm [shape: f32[16,8], index: 1, kind: input, shape index: {}]   ;;  %s1402_s2 = inlined_call_operand.hbm [shape: f32[8,16], index: 2, kind: input, shape index: {}]   ;;  %s1403_s3 = inlined_call_operand.hbm [shape: f32[8,8,8], index: 3, kind: output, shape index: {}]  }
   0x1   :  { %10 = vsyncpa [#allocation3 + $0x1], 0 }
   0x2   :  { %11 = vsyncpa [#allocation6], 0 }
   0x3   :  { %12 = vsyncpa [#allocation4], 0 }
   0x4   :  { %14 = vsyncpa [#allocation4 + $0x1], 0  ;;  %s1139_s12 = smov 0   ;;  %s1141_s13 = smov 0  }
   0x5   :  { %s1143_s14 = smov 0   ;;  %s1145_s15 = smov 0  }
   0x6 LB: > { %s1160_s16 = sadd.s32 4294967295, %s1106_s15   ;;  %s757_s17 = sadd.s32 4294967294, %s1106_s15   ;;  %s1106_s15 = sphi %s1145_s15, %s1423_s15   ;;  %s1102_s14 = sphi %s1143_s14, %s1422_s14   ;;  %s1098_s13 = sphi %s1141_s13, %s1421_s13   ;;  %s1094_s12 = sphi %s1139_s12, %s1420_s12  }
   0x7   : > { %p40_p0 = scmp.ne.s32.totalorder %s1098_s13, %s1094_s12  ;;  %p1404_p1 = scmp.eq.s32.totalorder %s1160_s16, 0 }
   0x8   : > { %p112_p3 = scmp.eq.s32.totalorder %s757_s17, 1  ;;  %p758_p5 = scmp.ge.s32.totalorder %s1106_s15, 1 }
   0x9   : > { %p1169_p4 = por %p1404_p1, %p40_p0  ;;  %p119_p7 = scmp.lt.s32.totalorder %s1106_s15, 3 }
   0xa   : > { %p1174_p6 = por %p112_p3, %p40_p0  ;;  %s1108_s21 = smov [#allocation5]  }
   0xb   : > { %s1407_s18 = scalar_select %p1169_p4, 1, 0 }
   0xc   : > { %s1408_s19 = scalar_select %p1174_p6, 1, 0 }
   0xd   : > { %p1179_p8 = pnand %p758_p5, %p119_p7  ;;  %s131_s22 = sshll.u32 %s1108_s21, 4  ;;  %s1183_s22 = int_to_ptr.vmem [resolvable:$true] %s131_s22 }
   0xe   : > { %s1109_s24 = smov [#allocation7]   ;;  %s950_s28 = scalar_lea.hbm %s1401_s1, 256 }
   0xf   : > { %p888_p9 = pneg %p1179_p8  ;;  %s145_s25 = sshll.u32 %s1109_s24, 4  ;;  %s1194_s25 = int_to_ptr.vmem [resolvable:$true] %s145_s25 }
  0x10   : > { %p951_p12 = scmp.ne.s32.totalorder %s1401_s1, %s950_s28  ;;  %p957_p5 = scmp.lt.u32.totalorder %s950_s28, %s1401_s1 }
  0x11   : > { %p1190_p11 = pnand %p888_p9, %p1404_p1 }
  0x13   : > { %p952_p13 = pneg %p1190_p11 }
  0x15   : > { %p953_p0 = pnand %p952_p13, %p951_p12 }
  0x17   : > { %p954_p3 = pneg %p953_p0 }
  0x19   : > { %p959_p7 = pnand %p957_p5, %p954_p3 }
  0x1b   : > { %962 = shalt.err (!%p959_p7)
}
  0x1c   : > { %s963_s6 = scalar_lea.vmem %s1183_s22, 256  ;;  %p971_p2 = scmp.lt.s32.totalorder %s1183_s22, %s1183_s22 }
  0x1d   : > { %p964_p9 = scmp.ne.s32.totalorder %s1183_s22, %s963_s6  ;;  %p972_p12 = scmp.lt.s32.totalorder %s963_s6, %s963_s6 }
  0x1f   : > { %p966_p10 = pnand %p964_p9, %p952_p13  ;;  %p973_p0 = por %p972_p12, %p971_p2 }
  0x21   : > { %p967_p1 = pneg %p966_p10 }
  0x23   : > { %p974_p6 = pnand %p973_p0, %p967_p1 }
  0x25   : > { %977 = shalt.err (!%p974_p6)
}
  0x26   : > { %s1110_s7 = smov 128   ;;  %s1111_s8 = smov 8  }
  0x27   : > { %891 = dma.hbm_to_vmem [thread:$0]  (!%p1190_p11), %s1401_s1, 256, %s1183_s22, [#allocation6], %s1110_s7, %s1110_s7, %s1111_s8  }
  0x28   : > { %s978_s21 = scalar_lea.hbm %s1402_s2, 128 }
  0x29   : > { %p979_p1 = scmp.ne.s32.totalorder %s1402_s2, %s978_s21  ;;  %p985_p10 = scmp.lt.u32.totalorder %s978_s21, %s1402_s2 }
  0x2b   : > { %p981_p2 = pnand %p979_p1, %p952_p13 }
  0x2d   : > { %p982_p6 = pneg %p981_p2 }
  0x2f   : > { %p987_p3 = pnand %p985_p10, %p982_p6 }
  0x31   : > { %990 = shalt.err (!%p987_p3)
}
  0x32   : > { %s991_s22 = scalar_lea.vmem %s1194_s25, 128  ;;  %p999_p12 = scmp.lt.s32.totalorder %s1194_s25, %s1194_s25 }
  0x33   : > { %p992_p5 = scmp.ne.s32.totalorder %s1194_s25, %s991_s22  ;;  %p1000_p0 = scmp.lt.s32.totalorder %s991_s22, %s991_s22 }
  0x35   : > { %p994_p7 = pnand %p992_p5, %p952_p13  ;;  %p1001_p1 = por %p1000_p0, %p999_p12 }
  0x37   : > { %p995_p9 = pneg %p994_p7 }
  0x39   : > { %p1002_p2 = pnand %p1001_p1, %p995_p9 }
  0x3b   : > { %1005 = shalt.err (!%p1002_p2)
}
  0x3c   : > { %894 = dma.hbm_to_vmem [thread:$0]  (!%p1190_p11), %s1402_s2, 128, %s1194_s25, [#allocation6]  }
  0x3d   : > { %s1252_s4 = sadd.s32 1, %s1106_s15   ;;  %s27_s23 = sadd.s32 1, %s1102_s14 }
  0x3e   : > { %s24_s5 = ssub.s32 %s1106_s15, %s1252_s4  ;;  %p34_p13 = scmp.ne.s32.totalorder %s1102_s14, %s1098_s13 }
  0x3f   : > { %p25_p6 = scmp.eq.s32.totalorder %s24_s5, 0  ;;  %p35_p10 = scmp.eq.s32.totalorder %s1106_s15, 0 }
  0x40   : > { %p1411_p3 = scmp.eq.s32.totalorder %s1160_s16, 1  ;;  %p905_p7 = scmp.lt.s32.totalorder %s1106_s15, 2 }
  0x41   : > { %s1268_s9 = scalar_select %p25_p6, %s1102_s14, %s27_s23  }
  0x42   : > { %p1262_p5 = por %p1411_p3, %p34_p13  ;;  %p36_p9 = por %p35_p10, %p34_p13 }
  0x43   : > { %s156_s10 = sand.u32 1, %s1102_s14   ;;  %s792_s25 = sshll.u32 %s1106_s15, 10 }
  0x44   : > { %s1412_s6 = scalar_select %p1262_p5, 1, 0 }
  0x45   : > { %s762_s11 = sshll.u32 %s156_s10, 6  ;;  %s1275_s24 = scalar_lea.hbm %s1400_s0, %s792_s25 }
  0x46   : > { %s160_s26 = scalar_lea.vmem [#allocation2], %s762_s11  ;;  %p1279_p11 = pnand %p905_p7, %p36_p9 }
  0x47   : > { %s168_s27 = sshll.u32 %s160_s26, 4  ;;  %s1283_s22 = scalar_lea.sflag [#allocation3], %s156_s10  ;;  %s1277_s27 = int_to_ptr.vmem [resolvable:$true] %s168_s27 }
  0x48   : > { %s1006_s29 = scalar_lea.hbm %s1275_s24, 1024  ;;  %p1008_p0 = pneg %p1279_p11 }
  0x49   : > { %p1007_p12 = scmp.ne.s32.totalorder %s1275_s24, %s1006_s29  ;;  %s1011_s5 = scalar_lea.hbm %s1400_s0, 2048 }
  0x4a   : > { %p1012_p13 = scmp.lt.u32.totalorder %s1275_s24, %s1400_s0  ;;  %p1013_p6 = scmp.lt.u32.totalorder %s1011_s5, %s1006_s29 }
  0x4b   : > { %p1009_p1 = pnand %p1008_p0, %p1007_p12  ;;  %p1015_p3 = scmp.lt.u32.totalorder %s1006_s29, %s1275_s24 }
  0x4c   : > { %p1014_p10 = por %p1013_p6, %p1012_p13 }
  0x4d   : > { %p1010_p2 = pneg %p1009_p1 }
  0x4e   : > { %p1016_p7 = por %p1015_p3, %p1014_p10 }
  0x50   : > { %p1017_p9 = pnand %p1016_p7, %p1010_p2 }
  0x52   : > { %1020 = shalt.err (!%p1017_p9)
}
  0x53   : > { %s1021_s10 = scalar_lea.vmem %s1277_s27, 1024  ;;  %s1112_s17 = smov [#allocation2]  }
  0x54   : > { %p1022_p12 = scmp.ne.s32.totalorder %s1277_s27, %s1021_s10  ;;  %s1026_s21 = sshll.u32 %s1112_s17, 4  ;;  %s1027_s21 = int_to_ptr.vmem [resolvable:$false] %s1026_s21 }
  0x55   : > { %s1028_s26 = scalar_lea.vmem %s1027_s21, 2048  ;;  %p1029_p4 = scmp.lt.s32.totalorder %s1277_s27, %s1027_s21 }
  0x56   : > { %p1024_p1 = pnand %p1022_p12, %p1008_p0  ;;  %p1030_p13 = scmp.lt.s32.totalorder %s1028_s26, %s1021_s10 }
  0x58   : > { %p1025_p5 = pneg %p1024_p1  ;;  %p1031_p6 = por %p1030_p13, %p1029_p4 }
  0x5a   : > { %p1032_p10 = pnand %p1031_p6, %p1025_p5 }
  0x5c   : > { %1035 = shalt.err (!%p1032_p10)
}
  0x5d   : > { %898 = dma.hbm_to_vmem [thread:$0]  (!%p1279_p11), %s1275_s24, 1024, %s1277_s27, %s1283_s22, %s1110_s7, %s1110_s7, %s1111_s8  }
  0x5e   : > { %180 = sbr.rel (%p1179_p8) target bundleno = 569 (0x239), region = 32  ;;  %s1317_s29 = sand.u32 (!%p1179_p8), 1, %s1098_s13  }
  0x5f   : > { %s767_s30 = sshll.u32 (!%p1179_p8), %s1317_s29, 6  ;;  %s183_s23 = scalar_lea.sflag (!%p1179_p8), [#allocation3], %s1317_s29 }
  0x60   : > { %s186_s5 = scalar_lea.vmem (!%p1179_p8), [#allocation2], %s767_s30  ;;  %p1414_p4 = scmp.ne.s32.totalorder (!%p1179_p8), %s1407_s18, 0 }
  0x65   : > { %1081 = dma.done.wait (%p1414_p4), %s183_s23, 1024  }
  0x66   : > { %1083 = vsyncadd (%p1414_p4), %s183_s23, 4294966272  ;;  %p1415_p5 = scmp.eq.s32.totalorder %s1160_s16, 0 }
  0x68   : > { %1085 = dma.done.wait (%p1415_p5), [#allocation6], 384   ;;  %p1416_p11 = pmov %p1415_p5 }
  0x69   : > { %vm230_vm0 = vcmask 130048   ;;  %v219_v0 = vld [vmem:[#allocation5] sm:$0xff]  ;;  %v220_v1 = vld [vmem:[#allocation5 + $0x8] sm:$0xff]  ;;  %v224_v5 = vld [vmem:[%s186_s5 + $0x10] sm:$0xff]  ;;  %v1113_v11 = vmov 0.0|0.0   ;;  %vm1114_vm1 = vmmov 0  }
  0x6a   : > { %1087 = vsyncadd (%p1416_p11), [#allocation6], 4294966912  ;;  %v222_v2 = vld [vmem:[%s186_s5] sm:$0xff]  ;;  %v860_v3 = vpack.c.bf16 %v220_v1, %v219_v0  ;;  %v223_v4 = vld [vmem:[%s186_s5 + $0x8] sm:$0xff]  ;;  %864 = vmatprep.subr.bf16.mxu1 %v1113_v11  ;;  %v1115_v12 = vmov 0.0   ;;  %s770_s18 = sshll.u32 %s1317_s29, 5 }
  0x6b   : > { %820 = vmatprep.mubr.msk.f32.mxu0 %vm230_vm0, %v222_v2  ;;  %v225_v6 = vld [vmem:[%s186_s5 + $0x18] sm:$0xff]  ;;  %v226_v7 = vld [vmem:[%s186_s5 + $0x20] sm:$0xff]  ;;  %v227_v8 = vld [vmem:[%s186_s5 + $0x28] sm:$0xff]  ;;  %836 = vmatprep.mubr.msk.f32.mxu1 %vm1114_vm1, %v1115_v12  ;;  %vm433_vm2 = vcmask 64512   ;;  %s216_s20 = scalar_lea.vmem [#allocation8], %s770_s18  ;;  %s793_s8 = sshll.u32 %s1160_s16, 9 }
  0x6c   : > { %861 = vmatprep.subr.bf16.mxu0 %v860_v3  ;;  %v228_v9 = vld [vmem:[%s186_s5 + $0x30] sm:$0xff]  ;;  %v229_v10 = vld [vmem:[%s186_s5 + $0x38] sm:$0xff]  ;;  %s665_s7 = sshll.u32 %s216_s20, 4  ;;  %s1355_s28 = scalar_lea.hbm %s1403_s3, %s793_s8  ;;  %s1349_s7 = int_to_ptr.vmem [resolvable:$true] %s665_s7 }
  0x6d   : > { %863 = vmatpush3.bf16.msra.mxu0 %v860_v3  ;;  %v221_v17 = vld [vmem:[#allocation7] sm:$0xff]  ;;  %s652_s22 = scalar_lea.sflag [#allocation4], %s1317_s29  ;;  %s1036_s16 = scalar_lea.vmem %s1349_s7, 512 }
  0x6e   : > { %p1037_p8 = scmp.ne.s32.totalorder %s1349_s7, %s1036_s16  ;;  %p1417_p0 = scmp.ne.s32.totalorder %s1412_s6, 0 }
  0x6f   : > { %s1116_s11 = smov [#allocation8]  }
  0x70   : > { %821 = vmatmul.mubr.msk.f32.vlgmr.msra.gmra.mrb[0].mxu0 %vm230_vm0, %v223_v4  ;;  %p1038_p2 = pnand %p1037_p8, %p1417_p0  ;;  %s1040_s25 = sshll.u32 %s1116_s11, 4  ;;  %s1041_s25 = int_to_ptr.vmem [resolvable:$false] %s1040_s25 }
  0x71   : > { %823 = vmatprep.mubr.msk.f32.mxu0 %vm230_vm0, %v224_v5  ;;  %s1042_s10 = scalar_lea.vmem %s1041_s25, 1024  ;;  %p1043_p7 = scmp.lt.s32.totalorder %s1349_s7, %s1041_s25 }
  0x72   : > { %p1039_p3 = pneg %p1038_p2  ;;  %p1044_p9 = scmp.lt.s32.totalorder %s1042_s10, %s1036_s16 }
  0x74   : > { %824 = vmatmul.mubr.msk.f32.gmra.mrb[2].mxu0 %vm230_vm0, %v225_v6  ;;  %p1045_p12 = por %p1044_p9, %p1043_p7 }
  0x75   : > { %826 = vmatprep.mubr.msk.f32.mxu0 %vm230_vm0, %v226_v7 }
  0x76   : > { %p1046_p1 = pnand %p1045_p12, %p1039_p3 }
  0x78   : > { %827 = vmatmul.mubr.msk.f32.gmra.mrb[4].mxu0 %vm230_vm0, %v227_v8 }
  0x79   : > { %829 = vmatprep.mubr.msk.f32.mxu0 %vm230_vm0, %v228_v9 }
  0x7c   : > { %830 = vmatmul.mubr.msk.f32.gmra.mrb[6].mxu0 %vm230_vm0, %v229_v10 }
 0x143   : > { %v822_v13 = vpop.f32.mrb[0].mxu0 }
 0x144   : > { %v321_v14 = vpop.f32.mrb[1].mxu0 }
 0x145   : > { %v865_v15 = vpack.c.bf16 %v822_v13, %v321_v14 }
 0x147   : > { %v825_v16 = vpop.f32.mrb[2].mxu0  ;;  %866 = vmatpush3.bf16.msra.mxu1 %v865_v15 }
 0x148   : > { %v331_v18 = vpop.f32.mrb[3].mxu0  ;;  %867 = vmatprep.subr.bf16.mxu1 %v1113_v11 }
 0x149   : > { %v868_v19 = vpack.c.bf16 %v825_v16, %v331_v18 }
 0x14a   : > { %837 = vmatmul.mubr.msk.f32.vlgmr.msra.gmra.mrb[0].mxu1 %vm230_vm0, %v221_v17 }
 0x14b   : > { %v828_v20 = vpop.f32.mrb[4].mxu0  ;;  %869 = vmatpush3.bf16.msra.mxu1 %v868_v19  ;;  %843 = vmatprep.mubr.msk.f32.mxu1 %vm1114_vm1, %v1115_v12 }
 0x14c   : > { %v341_v21 = vpop.f32.mrb[5].mxu0  ;;  %870 = vmatprep.subr.bf16.mxu1 %v1113_v11 }
 0x14d   : > { %v871_v22 = vpack.c.bf16 %v828_v20, %v341_v21 }
 0x14e   : > { %844 = vmatmul.mubr.msk.f32.vlgmr.msra.gmra.mrb[2].mxu1 %vm230_vm0, %v221_v17 }
 0x14f   : > { %v831_v23 = vpop.f32.mrb[6].mxu0  ;;  %872 = vmatpush3.bf16.msra.mxu1 %v871_v22  ;;  %850 = vmatprep.mubr.msk.f32.mxu1 %vm1114_vm1, %v1115_v12 }
 0x150   : > { %v351_v24 = vpop.f32.mrb[7].mxu0  ;;  %873 = vmatprep.subr.bf16.mxu1 %v1113_v11 }
 0x151   : > { %v874_v25 = vpack.c.bf16 %v831_v23, %v351_v24 }
 0x152   : > { %851 = vmatmul.mubr.msk.f32.vlgmr.msra.gmra.mrb[4].mxu1 %vm230_vm0, %v221_v17 }
 0x153   : > { %875 = vmatpush3.bf16.msra.mxu1 %v874_v25  ;;  %857 = vmatprep.mubr.msk.f32.mxu1 %vm1114_vm1, %v1115_v12 }
 0x156   : > { %858 = vmatmul.mubr.msk.f32.vlgmr.msra.gmra.mrb[6].mxu1 %vm230_vm0, %v221_v17 }
 0x21d   : > { %v429_v26 = vpop.f32.mrb[0].mxu1 }
 0x21e   : > { %434 = vst.msk [vmem:[%s216_s20] sm:$0xff] %vm433_vm2, %v429_v26  ;;  %v838_v27 = vpop.f32.mrb[1].mxu1 }
 0x221   : > { %v501_v28 = vpop.f32.mrb[2].mxu1 }
 0x222   : > { %781 = vst.msk [vmem:[%s216_s20 + $0x8] sm:$0xff] %vm433_vm2, %v501_v28  ;;  %v845_v29 = vpop.f32.mrb[3].mxu1 }
 0x225   : > { %v573_v30 = vpop.f32.mrb[4].mxu1 }
 0x226   : > { %783 = vst.msk [vmem:[%s216_s20 + $0x10] sm:$0xff] %vm433_vm2, %v573_v30  ;;  %v852_v31 = vpop.f32.mrb[5].mxu1 }
 0x229   : > { %v645_v32 = vpop.f32.mrb[6].mxu1 }
 0x22a   : > { %785 = vst.msk [vmem:[%s216_s20 + $0x18] sm:$0xff] %vm433_vm2, %v645_v32  ;;  %v859_v33 = vpop.f32.mrb[7].mxu1 }
 0x22b   : > { %1049 = shalt.err (!%p1046_p1)
}
 0x22c   : > { %s1050_s17 = scalar_lea.hbm %s1355_s28, 512  ;;  %s1054_s30 = scalar_lea.hbm %s1403_s3, 1024 }
 0x22d   : > { %p1051_p13 = scmp.ne.s32.totalorder %s1355_s28, %s1050_s17  ;;  %p1055_p4 = scmp.lt.u32.totalorder %s1355_s28, %s1403_s3 }
 0x22e   : > { %p1056_p5 = scmp.lt.u32.totalorder %s1054_s30, %s1050_s17  ;;  %p1058_p8 = scmp.lt.u32.totalorder %s1050_s17, %s1355_s28 }
 0x22f   : > { %p1052_p6 = pnand %p1051_p13, %p1417_p0 }
 0x230   : > { %p1057_p11 = por %p1056_p5, %p1055_p4 }
 0x231   : > { %p1053_p10 = pneg %p1052_p6 }
 0x232   : > { %p1059_p2 = por %p1058_p8, %p1057_p11 }
 0x234   : > { %p1060_p3 = pnand %p1059_p2, %p1053_p10 }
 0x236   : > { %1063 = shalt.err (!%p1060_p3)
}
 0x237   : > { %s1117_s18 = smov 128   ;;  %s1118_s20 = smov 8  }
 0x238   : > { %886 = dma.vmem_to_hbm [thread:$0]  (%p1417_p0), %s1349_s7, 512, %s1355_s28, %s652_s22, %s1117_s18, %s1117_s18, %s1118_s20  }
 0x239 PF: > { %s680_s8 = sand.u32 1, %s1094_s12   ;;  %p1418_p7 = scmp.ne.s32.totalorder %s1408_s19, 0 }
 0x23a   : > { %p1419_p9 = scmp.ge.s32.totalorder %s1106_s15, 2  ;;  %s681_s24 = scalar_lea.sflag [#allocation4], %s680_s8 }
 0x23c   : > { %p900_p12 = pnand %p1419_p9, %p1418_p7 }
 0x23e   : > { %1089 = dma.done.wait (!%p900_p12), %s681_s24, 512  }
 0x23f   : > { %1091 = vsyncadd (!%p900_p12), %s681_s24, 4294966784  ;;  %p17_p1 = scmp.ge.s32.totalorder %s1252_s4, 4   ;;  %s1420_s12 = smov %s1098_s13 }
 0x240   : > { %s1421_s13 = smov %s1102_s14  ;;  %s1422_s14 = smov %s1268_s9 }
 0x241   : > { %s1423_s15 = smov %s1252_s4  ;;  %19 = sbr.rel (!%p17_p1) target bundleno = 6 (0x6), region = 88 }
 0x248   :  { %686 = vsyncpa [#allocation3], 1 }
 0x249   :  { %688 = vsyncpa [#allocation3 + $0x1], 1 }
 0x24a   :  { %689 = vsyncpa [#allocation6], 1 }
 0x24b   :  { %690 = vsyncpa [#allocation4], 1 }
 0x24c   :  { %692 = vsyncpa [#allocation4 + $0x1], 1 }

</bundles_post_ra>
